<compile_context>
chip_gen: v5e
topology: v5e:2x2
jax: 0.10.0
libtpu: 0.0.40
codegen_flags: <defaults>
</compile_context>

<pallas_src>
import functools

import jax
import jax.numpy as jnp
from jax import lax
from jax.experimental import pallas as pl
from jax.experimental.pallas import tpu as pltpu

EPS = 1e-5
_INV_SQRT2 = 0.7071067811865476  # 1/sqrt(2), hoisted constant

# x:(m, k) contracted with w:(n, k) on the last dims -> (m, n)   (PyTorch weight layout)
_RHS_CONTRACT_LAST = (((1,), (1,)), ((), ()))


def _round_up(x, m):
    return (x + m - 1) // m * m


def _round_down_128(x):
    return max(128, (x // 128) * 128)


def _detect_vmem_capacity_bytes():
    try:
        cap = getattr(pltpu.get_tpu_info(), "vmem_capacity_bytes", None)
        if cap:
            return int(cap)
    except Exception:
        pass
    return 64 << 20  # conservative fallback: v7x per-TensorCore VMEM


_VMEM_CAPACITY = _detect_vmem_capacity_bytes()
_VMEM_BUDGET = (_VMEM_CAPACITY * 4) // 5  # ~51 MiB on v7x, ~102 MiB on v5e/v6e


# --------------------------------------------------------------------------------------
# Kernels
# --------------------------------------------------------------------------------------
def _mlp_fused_kernel(x_ref, w_ref, b_ref, o_ref, *scratch):
    """Fused path. grid = (feature tiles j, K tiles k); the full batch is resident."""
    # When the output is f32, the resident output block doubles as the accumulator.
    acc_ref = scratch[0] if scratch else o_ref
    k = pl.program_id(1)

    @pl.when(k == 0)
    def _():
        acc_ref[...] = jnp.zeros_like(acc_ref)

    # MXU matmul in the operands' native dtype (bf16 by default) with f32 accumulation;
    # the weight stays in PyTorch (out, in) layout -> contract on its last dim.
    acc_ref[...] += lax.dot_general(
        x_ref[...], w_ref[...], _RHS_CONTRACT_LAST,
        preferred_element_type=jnp.float32)

    @pl.when(k == pl.num_programs(1) - 1)
    def _():
        # f32 epilogue: bias + exact (erf) GELU + training-mode BatchNorm1d(affine=False)
        y = acc_ref[...].astype(jnp.float32) + b_ref[...].astype(jnp.float32)
        g = 0.5 * y * (1.0 + lax.erf(y * _INV_SQRT2))
        mean = jnp.mean(g, axis=0, keepdims=True)           # per-feature over full batch
        cen = g - mean
        var = jnp.mean(cen * cen, axis=0, keepdims=True)    # biased variance (PyTorch)
        o_ref[...] = (cen * lax.rsqrt(var + EPS)).astype(o_ref.dtype)


def _mlp_batched_kernel(x_ref, w_ref, b_ref, g_ref, sum_ref, ssq_ref, acc_ref, *,
                        n_valid, tb):
    """Batch-tiled path. grid = (feature tiles j, batch tiles b, K tiles k)."""
    b = pl.program_id(1)
    k = pl.program_id(2)

    @pl.when(k == 0)
    def _():
        acc_ref[...] = jnp.zeros_like(acc_ref)

    acc_ref[...] += lax.dot_general(
        x_ref[...], w_ref[...], _RHS_CONTRACT_LAST,
        preferred_element_type=jnp.float32)

    @pl.when(k == pl.num_programs(2) - 1)
    def _():
        y = acc_ref[...] + b_ref[...].astype(jnp.float32)
        g = 0.5 * y * (1.0 + lax.erf(y * _INV_SQRT2))
        g_ref[...] = g.astype(g_ref.dtype)

        # Exact per-feature statistics; padded batch rows are masked out.
        rows = lax.broadcasted_iota(jnp.int32, g.shape, 0) + b * tb
        gm = jnp.where(rows < n_valid, g, 0.0)
        s1 = jnp.sum(gm, axis=0, keepdims=True)
        s2 = jnp.sum(gm * gm, axis=0, keepdims=True)

        @pl.when(b == 0)
        def _():
            sum_ref[...] = s1
            ssq_ref[...] = s2

        @pl.when(b > 0)
        def _():
            sum_ref[...] += s1
            ssq_ref[...] += s2


# --------------------------------------------------------------------------------------
# Wrappers
# --------------------------------------------------------------------------------------
def _mlp_fused(x, weight, bias, N, inplane, outplane, Kp0, Fp0, tk, tn,
               mdt, mb, out_dtype, ob, f32_out):
    Kp = _round_up(Kp0, tk)
    Fp = _round_up(Fp0, tn)
    nj, nk = Fp // tn, Kp // tk

    xp = x.astype(mdt) if x.dtype != mdt else x
    wp = weight.astype(mdt) if weight.dtype != mdt else weight
    if Kp != inplane:
        xp = jnp.pad(xp, ((0, 0), (0, Kp - inplane)))
    if (Fp != outplane) or (Kp != inplane):
        wp = jnp.pad(wp, ((0, Fp - outplane), (0, Kp - inplane)))
    bp = bias.astype(jnp.float32)
    if Fp != outplane:
        bp = jnp.pad(bp, (0, Fp - outplane))
    bp = bp.reshape(1, Fp)

    scratch = [] if f32_out else [pltpu.VMEM((N, tn), jnp.float32)]

    need = 2 * (N * tk * mb + tn * tk * mb + tn * 4 + N * tn * ob)
    if not f32_out:
        need += N * tn * 4
    vmem_limit = int(min(_VMEM_BUDGET, max(int(need * 1.25), 32 << 20)))

    cost = pl.CostEstimate(
        flops=2 * N * Kp * Fp,
        transcendentals=N * Fp,
        bytes_accessed=int(nj * N * Kp * mb        # x is re-streamed once per feature tile
                           + Kp * Fp * mb + Fp * 4 + N * Fp * ob),
    )

    out = pl.pallas_call(
        _mlp_fused_kernel,
        out_shape=jax.ShapeDtypeStruct((N, Fp), out_dtype),
        grid_spec=pltpu.PrefetchScalarGridSpec(
            num_scalar_prefetch=0,
            grid=(nj, nk),
            in_specs=[
                pl.BlockSpec((N, tk), lambda j, k: (0, k)),    # x tile (full batch)
                pl.BlockSpec((tn, tk), lambda j, k: (j, k)),   # weight, PyTorch layout
                pl.BlockSpec((1, tn), lambda j, k: (0, j)),    # bias tile
            ],
            out_specs=pl.BlockSpec((N, tn), lambda j, k: (0, j)),
            scratch_shapes=scratch,
        ),
        compiler_params=pltpu.CompilerParams(
            dimension_semantics=("parallel", "arbitrary"),
            vmem_limit_bytes=vmem_limit,
        ),
        cost_estimate=cost,
    )(xp, wp, bp)
    return out[:, :outplane]


def _mlp_batched(x, weight, bias, N, inplane, outplane, Kp0, Fp0, tk, tn, tb,
                 mdt, mb, out_dtype, ob):
    Kp = _round_up(Kp0, tk)
    Fp = _round_up(Fp0, tn)
    Np = _round_up(N, tb)
    nj, nb, nk = Fp // tn, Np // tb, Kp // tk

    xp = x.astype(mdt) if x.dtype != mdt else x
    wp = weight.astype(mdt) if weight.dtype != mdt else weight
    if (Kp != inplane) or (Np != N):
        xp = jnp.pad(xp, ((0, Np - N), (0, Kp - inplane)))
    if (Fp != outplane) or (Kp != inplane):
        wp = jnp.pad(wp, ((0, Fp - outplane), (0, Kp - inplane)))
    bp = bias.astype(jnp.float32)
    if Fp != outplane:
        bp = jnp.pad(bp, (0, Fp - outplane))
    bp = bp.reshape(1, Fp)

    need = (2 * (tb * tk * mb + tn * tk * mb + tn * 4 + tb * tn * ob + 2 * tn * 4)
            + tb * tn * 4)
    vmem_limit = int(min(_VMEM_BUDGET, max(int(need * 1.25), 32 << 20)))

    cost = pl.CostEstimate(
        flops=2 * Np * Kp * Fp,
        transcendentals=Np * Fp,
        bytes_accessed=int(nj * Np * Kp * mb + nb * Kp * Fp * mb + Fp * 4
                           + Np * Fp * ob + 2 * Fp * 4),
    )

    kernel = functools.partial(_mlp_batched_kernel, n_valid=N, tb=tb)
    g, s1, s2 = pl.pallas_call(
        kernel,
        out_shape=(
            jax.ShapeDtypeStruct((Np, Fp), out_dtype),    # GELU(linear), pre-BN
            jax.ShapeDtypeStruct((1, Fp), jnp.float32),   # per-feature sum
            jax.ShapeDtypeStruct((1, Fp), jnp.float32),   # per-feature sum of squares
        ),
        grid_spec=pltpu.PrefetchScalarGridSpec(
            num_scalar_prefetch=0,
            grid=(nj, nb, nk),
            in_specs=[
                pl.BlockSpec((tb, tk), lambda j, b, k: (b, k)),   # x tile
                pl.BlockSpec((tn, tk), lambda j, b, k: (j, k)),   # weight tile
                pl.BlockSpec((1, tn), lambda j, b, k: (0, j)),    # bias tile
            ],
            out_specs=(
                pl.BlockSpec((tb, tn), lambda j, b, k: (b, j)),
                pl.BlockSpec((1, tn), lambda j, b, k: (0, j)),
                pl.BlockSpec((1, tn), lambda j, b, k: (0, j)),
            ),
            scratch_shapes=[pltpu.VMEM((tb, tn), jnp.float32)],
        ),
        compiler_params=pltpu.CompilerParams(
            dimension_semantics=("parallel", "arbitrary", "arbitrary"),
            vmem_limit_bytes=vmem_limit,
        ),
        cost_estimate=cost,
    )(xp, wp, bp)

    # Finalize training-mode BatchNorm (affine=False) as a cheap fused elementwise op.
    mean = s1[:, :outplane] / N
    var = jnp.maximum(s2[:, :outplane] / N - mean * mean, 0.0)
    gf = g[:N, :outplane].astype(jnp.float32)
    return ((gf - mean) * lax.rsqrt(var + EPS)).astype(out_dtype)


@functools.partial(jax.jit, static_argnames=("matmul_dtype", "tn", "tk", "batch_tile"))
def mlp_block(x, weight, bias, *, matmul_dtype=jnp.bfloat16, tn=512, tk=2048,
              batch_tile=None):
    """x: (N, inplane); weight: (outplane, inplane) PyTorch layout; bias: (outplane,)."""
    N, inplane = x.shape
    outplane = weight.shape[0]
    out_dtype = x.dtype
    mdt = jnp.dtype(matmul_dtype)
    mb = mdt.itemsize
    ob = jnp.dtype(out_dtype).itemsize
    f32_out = jnp.dtype(out_dtype) == jnp.float32

    # ---- static tile selection --------------------------------------------------------
    Kp0 = _round_up(inplane, 128)
    Fp0 = _round_up(outplane, 128)
    tk_req = _round_down_128(min(tk, Kp0))
    tn_req = _round_down_128(min(tn, Fp0))
    if Fp0 >= 256:  # guarantee >=2 feature tiles so v7x's second TensorCore is used
        tn_req = min(tn_req, _round_down_128(Fp0 // 2))

    def fused_need(tk_, tn_):
        need = 2 * (N * tk_ * mb + tn_ * tk_ * mb + tn_ * 4 + N * tn_ * ob)
        if not f32_out:
            need += N * tn_ * 4
        return need

    tk_f, tn_f = tk_req, tn_req
    fused_fits = batch_tile is None
    if fused_fits:
        while fused_need(tk_f, tn_f) > _VMEM_BUDGET:
            if tk_f > 512:
                tk_f = _round_down_128(tk_f // 2)
            elif tn_f > 128:
                tn_f = _round_down_128(tn_f // 2)
            elif tk_f > 128:
                tk_f = _round_down_128(tk_f // 2)
            else:
                fused_fits = False   # full batch cannot stay resident -> batch-tile BN
                break

    if fused_fits:
        return _mlp_fused(x, weight, bias, N, inplane, outplane, Kp0, Fp0,
                          tk_f, tn_f, mdt, mb, out_dtype, ob, f32_out)

    # ---- batch-tiled fallback ---------------------------------------------------------
    tb = 512 if batch_tile is None else int(batch_tile)
    tb = max(8, (tb // 8) * 8)
    tb = min(tb, _round_up(N, 8))
    tk_b, tn_b = tk_req, tn_req

    def batched_need(tb_, tk_, tn_):
        return (2 * (tb_ * tk_ * mb + tn_ * tk_ * mb + tn_ * 4 + tb_ * tn_ * ob
                     + 2 * tn_ * 4) + tb_ * tn_ * 4)

    while batched_need(tb, tk_b, tn_b) > _VMEM_BUDGET:
        if tk_b > 512:
            tk_b = _round_down_128(tk_b // 2)
        elif tb > 256:
            tb = max(8, ((tb // 2) // 8) * 8)
        elif tn_b > 128:
            tn_b = _round_down_128(tn_b // 2)
        elif tk_b > 128:
            tk_b = _round_down_128(tk_b // 2)
        elif tb > 8:
            tb = max(8, ((tb // 2) // 8) * 8)
        else:
            break

    return _mlp_batched(x, weight, bias, N, inplane, outplane, Kp0, Fp0,
                        tk_b, tn_b, tb, mdt, mb, out_dtype, ob)


# --------------------------------------------------------------------------------------
# Reference + tests
# --------------------------------------------------------------------------------------
def _reference(x, weight, bias, matmul_dtype=None):
    if matmul_dtype is None:
        y = x @ weight.T + bias
    else:
        y = lax.dot_general(x.astype(matmul_dtype), weight.astype(matmul_dtype),
                            _RHS_CONTRACT_LAST,
                            preferred_element_type=jnp.float32) + bias
    g = 0.5 * y * (1.0 + lax.erf(y * _INV_SQRT2))
    m = jnp.mean(g, axis=0, keepdims=True)
    v = jnp.mean((g - m) ** 2, axis=0, keepdims=True)
    return (g - m) / jnp.sqrt(v + EPS)


if __name__ == "__main__":
    key = jax.random.PRNGKey(0)

    def make_inputs(k, batch, inp, outp):
        kx, kw, kb = jax.random.split(k, 3)
        x = jax.random.normal(kx, (batch, inp), dtype=jnp.float32)
        bound = 1.0 / float(inp) ** 0.5
        w = jax.random.uniform(kw, (outp, inp), jnp.float32, -bound, bound)
        b = jax.random.uniform(kb, (outp,), jnp.float32, -bound, bound)
        return x, w, b

    k1, k2, k3 = jax.random.split(key, 3)

    # --- Test 1: shapes consistent with MLPBlock(inplane=16, outplane=32), batch=8 ------
    x, w, b = make_inputs(k1, 8, 16, 32)
    out = jax.block_until_ready(mlp_block(x, w, b, matmul_dtype=jnp.float32))
    assert out.shape == (8, 32)
    assert jnp.allclose(out, _reference(x, w, b), atol=1e-4, rtol=1e-4), "test1 f32"
    out = jax.block_until_ready(mlp_block(x, w, b))  # default bf16-MXU path
    assert jnp.allclose(out, _reference(x, w, b, jnp.bfloat16),
                        atol=2e-3, rtol=2e-3), "test1 bf16"

    # --- Test 2: non-128-multiple features, multi-tile grid + K accumulator -------------
    x2, w2, b2 = make_inputs(k2, 16, 200, 300)
    out2 = jax.block_until_ready(
        mlp_block(x2, w2, b2, matmul_dtype=jnp.float32, tn=128, tk=128))
    assert out2.shape == (16, 300)
    assert jnp.allclose(out2, _reference(x2, w2, b2), atol=1e-4, rtol=1e-4), "test2 f32"
    out2 = jax.block_until_ready(mlp_block(x2, w2, b2))
    assert jnp.allclose(out2, _reference(x2, w2, b2, jnp.bfloat16),
                        atol=2e-3, rtol=2e-3), "test2 bf16"

    # --- Test 3: forced batch-tiled path with a partial last batch tile (masking) -------
    x3, w3, b3 = make_inputs(k3, 60, 160, 384)
    out3 = jax.block_until_ready(
        mlp_block(x3, w3, b3, matmul_dtype=jnp.float32, batch_tile=16))
    assert out3.shape == (60, 384)
    assert jnp.allclose(out3, _reference(x3, w3, b3), atol=5e-4, rtol=5e-4), "test3 f32"
    out3 = jax.block_until_ready(mlp_block(x3, w3, b3, batch_tile=16))
    assert jnp.allclose(out3, _reference(x3, w3, b3, jnp.bfloat16),
                        atol=2e-3, rtol=2e-3), "test3 bf16"

    print("KERNEL_OK")
</pallas_src>

<mosaic_0001>
module attributes {stable_mosaic.version = 11 : i64} {
  func.func @_mlp_fused_kernel(%arg0: i32, %arg1: i32, %arg2: memref<8x128xf32, #tpu.memory_space<vmem>>, %arg3: memref<128x128xf32, #tpu.memory_space<vmem>>, %arg4: memref<1x128xf32, #tpu.memory_space<vmem>>, %arg5: memref<8x128xf32, #tpu.memory_space<vmem>>) attributes {dimension_semantics = [#tpu.dimension_semantics<parallel>, #tpu.dimension_semantics<arbitrary>], iteration_bounds = array<i64: 1, 1>, scalar_prefetch = 0 : i64, scratch_operands = 0 : i64, tpu.core_type = #tpu.core_type<tc>, window_params = [{transform_indices = @transform_0, window_bounds = array<i64: 8, 128>}, {transform_indices = @transform_1, window_bounds = array<i64: 128, 128>}, {transform_indices = @transform_2, window_bounds = array<i64: 1, 128>}, {transform_indices = @transform_3, window_bounds = array<i64: 8, 128>}]} {
    %c0_i32 = arith.constant 0 : i32
    %0 = arith.cmpi eq, %arg1, %c0_i32 : i32
    %1 = arith.extui %0 : i1 to i32
    %c0_i32_0 = arith.constant 0 : i32
    %2 = arith.cmpi ne, %1, %c0_i32_0 : i32
    scf.if %2 {
      %cst_10 = arith.constant 0.000000e+00 : f32
      %12 = vector.broadcast %cst_10 : f32 to vector<8x128xf32>
      %c0_11 = arith.constant 0 : index
      %c0_12 = arith.constant 0 : index
      %13 = vector.load %arg5[%c0_11, %c0_12] : memref<8x128xf32, #tpu.memory_space<vmem>>, vector<8x128xf32>
      tpu.vector_store %arg5[%c0_11, %c0_12], %12 {strides = array<i32>} : memref<8x128xf32, #tpu.memory_space<vmem>>, vector<8x128xf32>,
    } else {
    }
    %c0 = arith.constant 0 : index
    %c0_1 = arith.constant 0 : index
    %3 = vector.load %arg5[%c0, %c0_1] : memref<8x128xf32, #tpu.memory_space<vmem>>, vector<8x128xf32>
    %c0_2 = arith.constant 0 : index
    %c0_3 = arith.constant 0 : index
    %4 = vector.load %arg2[%c0_2, %c0_3] : memref<8x128xf32, #tpu.memory_space<vmem>>, vector<8x128xf32>
    %c0_4 = arith.constant 0 : index
    %c0_5 = arith.constant 0 : index
    %5 = vector.load %arg3[%c0_4, %c0_5] : memref<128x128xf32, #tpu.memory_space<vmem>>, vector<128x128xf32>
    %cst = arith.constant dense<0.000000e+00> : vector<8x128xf32>
    %6 = tpu.matmul %4, %5, %cst {dimension_numbers = #tpu.dot_dimension_numbers<[1], [1], [0], [0], [0, 0, 1, 0], [], []>} : vector<8x128xf32>, vector<128x128xf32>, vector<8x128xf32> -> vector<8x128xf32>
    %7 = arith.addf %3, %6 : vector<8x128xf32>
    %c0_6 = arith.constant 0 : index
    %c0_7 = arith.constant 0 : index
    %8 = vector.load %arg5[%c0_6, %c0_7] : memref<8x128xf32, #tpu.memory_space<vmem>>, vector<8x128xf32>
    tpu.vector_store %arg5[%c0_6, %c0_7], %7 {strides = array<i32>} : memref<8x128xf32, #tpu.memory_space<vmem>>, vector<8x128xf32>,
    %c0_i32_8 = arith.constant 0 : i32
    %9 = arith.cmpi eq, %arg1, %c0_i32_8 : i32
    %10 = arith.extui %9 : i1 to i32
    %c0_i32_9 = arith.constant 0 : i32
    %11 = arith.cmpi ne, %10, %c0_i32_9 : i32
    scf.if %11 {
      %c0_10 = arith.constant 0 : index
      %c0_11 = arith.constant 0 : index
      %12 = vector.load %arg5[%c0_10, %c0_11] : memref<8x128xf32, #tpu.memory_space<vmem>>, vector<8x128xf32>
      %c0_12 = arith.constant 0 : index
      %c0_13 = arith.constant 0 : index
      %13 = vector.load %arg4[%c0_12, %c0_13] : memref<1x128xf32, #tpu.memory_space<vmem>>, vector<1x128xf32>
      %14 = vector.broadcast %13 : vector<1x128xf32> to vector<8x128xf32>
      %15 = arith.addf %12, %14 : vector<8x128xf32>
      %cst_14 = arith.constant 5.000000e-01 : f32
      %16 = vector.broadcast %cst_14 : f32 to vector<8x128xf32>
      %17 = arith.mulf %16, %15 : vector<8x128xf32>
      %cst_15 = arith.constant 0.707106769 : f32
      %18 = vector.broadcast %cst_15 : f32 to vector<8x128xf32>
      %19 = arith.mulf %15, %18 : vector<8x128xf32>
      %20 = math.erf %19 : vector<8x128xf32>
      %cst_16 = arith.constant 1.000000e+00 : f32
      %21 = vector.broadcast %cst_16 : f32 to vector<8x128xf32>
      %22 = arith.addf %21, %20 : vector<8x128xf32>
      %23 = arith.mulf %17, %22 : vector<8x128xf32>
      %cst_17 = arith.constant dense<0.000000e+00> : vector<128xf32>
      %24 = vector.multi_reduction <add>, %23, %cst_17 [0] : vector<8x128xf32> to vector<128xf32>
      %25 = vector.shape_cast %24 : vector<128xf32> to vector<1x128xf32>
      %cst_18 = arith.constant 8.000000e+00 : f32
      %26 = vector.broadcast %cst_18 : f32 to vector<1x128xf32>
      %27 = arith.divf %25, %26 : vector<1x128xf32>
      %28 = vector.broadcast %27 : vector<1x128xf32> to vector<8x128xf32>
      %29 = arith.subf %23, %28 : vector<8x128xf32>
      %30 = arith.mulf %29, %29 : vector<8x128xf32>
      %cst_19 = arith.constant dense<0.000000e+00> : vector<128xf32>
      %31 = vector.multi_reduction <add>, %30, %cst_19 [0] : vector<8x128xf32> to vector<128xf32>
      %32 = vector.shape_cast %31 : vector<128xf32> to vector<1x128xf32>
      %cst_20 = arith.constant 8.000000e+00 : f32
      %33 = vector.broadcast %cst_20 : f32 to vector<1x128xf32>
      %34 = arith.divf %32, %33 : vector<1x128xf32>
      %cst_21 = arith.constant 9.99999974E-6 : f32
      %35 = vector.broadcast %cst_21 : f32 to vector<1x128xf32>
      %36 = arith.addf %34, %35 : vector<1x128xf32>
      %37 = math.rsqrt %36 : vector<1x128xf32>
      %38 = vector.broadcast %37 : vector<1x128xf32> to vector<8x128xf32>
      %39 = arith.mulf %29, %38 : vector<8x128xf32>
      %c0_22 = arith.constant 0 : index
      %c0_23 = arith.constant 0 : index
      %40 = vector.load %arg5[%c0_22, %c0_23] : memref<8x128xf32, #tpu.memory_space<vmem>>, vector<8x128xf32>
      tpu.vector_store %arg5[%c0_22, %c0_23], %39 {strides = array<i32>} : memref<8x128xf32, #tpu.memory_space<vmem>>, vector<8x128xf32>,
    } else {
    }
    return
  }
  func.func @transform_0(%arg0: i32, %arg1: i32) -> (i32, i32) {
    %c0_i32 = arith.constant 0 : i32
    %c0_i32_0 = arith.constant 0 : i32
    return %c0_i32, %arg1 : i32, i32
  }
  func.func @transform_1(%arg0: i32, %arg1: i32) -> (i32, i32) {
    %c0_i32 = arith.constant 0 : i32
    return %arg0, %arg1 : i32, i32
  }
  func.func @transform_2(%arg0: i32, %arg1: i32) -> (i32, i32) {
    %c0_i32 = arith.constant 0 : i32
    %c0_i32_0 = arith.constant 0 : i32
    return %c0_i32, %arg0 : i32, i32
  }
  func.func @transform_3(%arg0: i32, %arg1: i32) -> (i32, i32) {
    %c0_i32 = arith.constant 0 : i32
    %c0_i32_0 = arith.constant 0 : i32
    return %c0_i32, %arg0 : i32, i32
  }
}

</mosaic_0001>

<bundles_post_ra>
// kernel: mlp_block.1
= control target key start
LH: loop header
LB: loop body
LE: loop exit
PB: predicated region body
PF: predicated region fallthrough
CT: control target
= control target key end

     0   :  { %s281_s0 = inlined_call_operand.vmem [shape: f32[8,128], index: 0, kind: input, shape index: {}]   ;;  %s282_s1 = inlined_call_operand.vmem [shape: f32[128,128], index: 1, kind: input, shape index: {}]   ;;  %s283_s2 = inlined_call_operand.vmem [shape: f32[1,128], index: 2, kind: input, shape index: {}]   ;;  %s284_s3 = inlined_call_operand.hbm [shape: f32[8,128], index: 3, kind: output, shape index: {}]  }
   0x1   :  { %v37_v0 = vld [vmem:[%s282_s1 + $0x78] sm:$0xff]  ;;  %v36_v1 = vld [vmem:[%s282_s1 + $0x70] sm:$0xff] }
   0x2   :  { %38 = vmatpush.xpose.msra.mxu0 %v37_v0 }
   0x3   :  { %8 = vsyncpa [#allocation3], 0  ;;  %v35_v2 = vld [vmem:[%s282_s1 + $0x68] sm:$0xff]  ;;  %v34_v3 = vld [vmem:[%s282_s1 + $0x60] sm:$0xff]  ;;  %v202_v45 = vmov 8.0   ;;  %s156_s22 = sshll.u32 %s284_s3, 4  ;;  %s157_s22 = int_to_ptr.hbm [resolvable:$true] %s156_s22 }
   0x4   :  { %v33_v4 = vld [vmem:[%s282_s1 + $0x58] sm:$0xff]  ;;  %v32_v5 = vld [vmem:[%s282_s1 + $0x50] sm:$0xff]  ;;  %v31_v6 = vld [vmem:[%s282_s1 + $0x48] sm:$0xff] }
   0x5   :  { %v30_v7 = vld [vmem:[%s282_s1 + $0x40] sm:$0xff]  ;;  %v29_v8 = vld [vmem:[%s282_s1 + $0x38] sm:$0xff]  ;;  %v28_v9 = vld [vmem:[%s282_s1 + $0x30] sm:$0xff] }
   0x6   :  { %39 = vmatpush.xpose.msra.mxu0 %v36_v1  ;;  %v27_v10 = vld [vmem:[%s282_s1 + $0x28] sm:$0xff]  ;;  %v26_v11 = vld [vmem:[%s282_s1 + $0x20] sm:$0xff]  ;;  %v25_v12 = vld [vmem:[%s282_s1 + $0x18] sm:$0xff] }
   0x7   :  { %v24_v13 = vld [vmem:[%s282_s1 + $0x10] sm:$0xff]  ;;  %v23_v14 = vld [vmem:[%s282_s1 + $0x8] sm:$0xff]  ;;  %v22_v15 = vld [vmem:[%s282_s1] sm:$0xff] }
   0x8   :  { %v21_v16 = vld [vmem:[%s281_s0] sm:$0xff]  ;;  %s203_s0 = smov [#allocation2]  }
   0x9   :  { %v169_v17 = vld [vmem:[%s283_s2] ss:$0 sm:$0xff]  ;;  %s154_s1 = sshll.u32 %s203_s0, 4  ;;  %s155_s1 = int_to_ptr.vmem [resolvable:$true] %s154_s1 }
   0xa   :  { %40 = vmatpush.xpose.msra.mxu0 %v35_v2 }
   0xe   :  { %41 = vmatpush.xpose.msra.mxu0 %v34_v3 }
  0x12   :  { %42 = vmatpush.xpose.msra.mxu0 %v33_v4 }
  0x16   :  { %43 = vmatpush.xpose.msra.mxu0 %v32_v5 }
  0x1a   :  { %44 = vmatpush.xpose.msra.mxu0 %v31_v6 }
  0x1e   :  { %45 = vmatpush.xpose.msra.mxu0 %v30_v7 }
  0x22   :  { %46 = vmatpush.xpose.msra.mxu0 %v29_v8 }
  0x26   :  { %47 = vmatpush.xpose.msra.mxu0 %v28_v9 }
  0x2a   :  { %48 = vmatpush.xpose.msra.mxu0 %v27_v10 }
  0x2e   :  { %49 = vmatpush.xpose.msra.mxu0 %v26_v11 }
  0x32   :  { %50 = vmatpush.xpose.msra.mxu0 %v25_v12 }
  0x36   :  { %51 = vmatpush.xpose.msra.mxu0 %v24_v13 }
  0x3a   :  { %52 = vmatpush.xpose.msra.mxu0 %v23_v14 }
  0x3e   :  { %53 = vmatpush.xpose.msra.mxu0 %v22_v15 }
  0x41   :  { %54 = vmatmul.f32.vlgmr.msra.gmra.mxu0 %v21_v16 }
  0xbe   :  { %v55_v18 = vpop.f32.mrf.mxu0 }
  0xbf   :  { %v68_v19 = vadd.f32 %v169_v17, %v55_v18 }
  0xc1   :  { %v70_v20 = vmul.f32 0.70710677, %v68_v19  ;;  %v69_v59 = vmul.f32 0.5, %v68_v19 }
  0xc3   :  { %v71_v21 = vmul.f32 %v70_v20, %v70_v20 }
  0xc5   :  { %v72_v22 = vmin.f32 %v71_v21, 16.0 }
  0xc7   :  { %v73_v23 = vmul.f32 2.1237322e-06, %v72_v22  ;;  %v84_v24 = vmul.f32 3.8918573e-05, %v72_v22 }
  0xc9   :  { %v74_v25 = vadd.f32 0.00028619796, %v73_v23  ;;  %v85_v26 = vadd.f32 0.001143296, %v84_v24 }
  0xcb   :  { %v75_v27 = vmul.f32 %v74_v25, %v72_v22  ;;  %v86_v28 = vmul.f32 %v85_v26, %v72_v22 }
  0xcd   :  { %v87_v29 = vadd.f32 0.014752088, %v86_v28  ;;  %v76_v30 = vadd.f32 0.0036580483, %v75_v27 }
  0xcf   :  { %v88_v31 = vmul.f32 %v87_v29, %v72_v22  ;;  %v77_v33 = vmul.f32 %v76_v30, %v72_v22 }
  0xd1   :  { %v89_v32 = vadd.f32 0.112945676, %v88_v31  ;;  %v78_v36 = vadd.f32 0.05243302, %v77_v33 }
  0xd3   :  { %v90_v34 = vmul.f32 %v89_v32, %v72_v22  ;;  %v79_v39 = vmul.f32 %v78_v36, %v72_v22 }
  0xd5   :  { %v91_v35 = vadd.f32 0.4994258, %v90_v34  ;;  %v80_v40 = vadd.f32 0.18741608, %v79_v39 }
  0xd7   :  { %v92_v37 = vmul.f32 %v91_v35, %v72_v22  ;;  %v81_v42 = vmul.f32 %v80_v40, %v72_v22 }
  0xd9   :  { %v93_v38 = vadd.f32 1.0, %v92_v37  ;;  %v82_v47 = vadd.f32 1.1283791, %v81_v42 }
  0xdb   :  { %170 = vrcp.f32 %v93_v38  ;;  %v105_v46 = vand.u32 2147483648, %v93_v38  ;;  %v103_v49 = vand.u32 2147483647, %v93_v38  ;;  %vm99_vm1 = vweird.f32 %v93_v38 }
  0xdc   :  { %172 = vrcp.f32 %v202_v45  ;;  %v83_v53 = vmul.f32 %v82_v47, %v70_v20 }
  0xdd   :  { %v106_v51 = vor.u32 1.1754944e-38, %v105_v46  ;;  %vm104_vm3 = vcmp.eq.f32.partialorder %v103_v49, 8.507059e+37 }
  0xe1   :  { %v171_v41 = vpop.eup %170 }
  0xe2   :  { %v95_v43 = vmul.f32 %v171_v41, %v93_v38  ;;  %vm100_vm0 = vweird.f32 %v171_v41  ;;  %v173_v52 = vpop.eup %172 }
  0xe3   :  { %vm101_vm2 = vmor %vm99_vm1, %vm100_vm0  ;;  %v120_v57 = vmul.f32 8.0, %v173_v52  ;;  %vm124_vm4 = vweird.f32 %v173_v52 }
  0xe4   :  { %v96_v44 = vsub.f32 1.0, %v95_v43 }
  0xe5   :  { %v121_v61 = vsub.f32 1.0, %v120_v57 }
  0xe6   :  { %v97_v48 = vmul.f32 %v171_v41, %v96_v44 }
  0xe7   :  { %v122_v0 = vmul.f32 %v173_v52, %v121_v61 }
  0xe8   :  { %v98_v50 = vadd.f32 %v171_v41, %v97_v48 }
  0xe9   :  { %v123_v3 = vadd.f32 %v173_v52, %v122_v0 }
  0xea   :  { %v102_v54 = vsel %vm101_vm2, %v171_v41, %v98_v50 }
  0xeb   :  { %v107_v55 = vsel %vm104_vm3, %v106_v51, %v102_v54  ;;  %v125_v6 = vsel %vm124_vm4, %v173_v52, %v123_v3 }
  0xec   :  { %v108_v56 = vmul.f32 %v107_v55, %v83_v53 }
  0xee   :  { %v165_v58 = vclamps-f32 %v108_v56, 1.0 }
  0xf0   :  { %v111_v60 = vadd.f32 1.0, %v165_v58 }
  0xf2   :  { %v112_v62 = vmul.f32 %v111_v60, %v69_v59 }
  0xf4   :  { %v113_v63 = vrot.slane %v112_v62, 4 }
  0xf6   :  { %v114_v1 = vadd.f32 %v113_v63, %v112_v62 }
  0xf8   :  { %v115_v2 = vrot.slane %v114_v1, 2 }
  0xfa   :  { %v116_v4 = vadd.f32 %v115_v2, %v114_v1 }
  0xfc   :  { %v117_v5 = vrot.slane %v116_v4, 1 }
  0xfe   :  { %v118_v7 = vadd.f32 %v117_v5, %v116_v4 }
 0x100   :  { %v126_v8 = vmul.f32 %v125_v6, %v118_v7 }
 0x102   :  { %v127_v9 = vsub.f32 %v112_v62, %v126_v8 }
 0x104   :  { %v128_v10 = vmul.f32 %v127_v9, %v127_v9 }
 0x106   :  { %v129_v11 = vrot.slane %v128_v10, 4 }
 0x108   :  { %v130_v12 = vadd.f32 %v129_v11, %v128_v10 }
 0x10a   :  { %v131_v13 = vrot.slane %v130_v12, 2 }
 0x10c   :  { %v132_v14 = vadd.f32 %v131_v13, %v130_v12 }
 0x10e   :  { %v133_v15 = vrot.slane %v132_v14, 1 }
 0x110   :  { %v134_v16 = vadd.f32 %v133_v15, %v132_v14 }
 0x112   :  { %v135_v17 = vmul.f32 %v134_v16, %v125_v6 }
 0x114   :  { %v136_v18 = vadd.f32 1e-05, %v135_v17 }
 0x116   :  { %174 = vrsqrt.f32 %v136_v18  ;;  %vm143_vm6 = vweird.f32 %v136_v18 }
 0x11c   :  { %v175_v19 = vpop.eup %174 }
 0x11d   :  { %v138_v20 = vmul.f32 %v175_v19, %v136_v18  ;;  %vm144_vm5 = vweird.f32 %v175_v19 }
 0x11e   :  { %vm145_vm7 = vmor %vm143_vm6, %vm144_vm5 }
 0x11f   :  { %v139_v21 = vmul.f32 %v175_v19, %v138_v20 }
 0x121   :  { %v140_v22 = vmul.f32 0.5, %v139_v21 }
 0x123   :  { %v141_v23 = vsub.f32 1.5, %v140_v22 }
 0x125   :  { %v142_v24 = vmul.f32 %v175_v19, %v141_v23 }
 0x127   :  { %v146_v25 = vsel %vm145_vm7, %v175_v19, %v142_v24 }
 0x128   :  { %v147_v26 = vmul.f32 %v146_v25, %v127_v9 }
 0x12a   :  { %148 = vst [vmem:[#allocation2] sm:$0xff] %v147_v26 }
 0x12b   :  { %159 = dma.vmem_to_hbm [thread:$0]  %s155_s1, 128, %s157_s22, [#allocation3]  }
 0x12c   :  { %200 = dma.done.wait [#allocation3], 128  }
 0x12d   :  { %201 = vsyncadd [#allocation3], 4294967168 }
 0x12e   :  { %164 = vsyncpa [#allocation3], 1 }

</bundles_post_ra>
